<compile_context>
chip_gen: v6e
topology: v6e:2x2x1
jax: 0.10.0
libtpu: 0.0.40
codegen_flags: <defaults>
</compile_context>

<pallas_src>
import functools

import jax
import jax.numpy as jnp
from jax.experimental import pallas as pl
from jax.experimental.pallas import tpu as pltpu

LANE = 128      # lane width  (last dim)
SUBLANE = 8     # sublane width (second-to-last dim)


def _round_up(x, m):
    return ((x + m - 1) // m) * m


# ----------------------------- Pallas kernel ------------------------------- #

def _fused_gnn_kernel(a_ref, x_ref, m_ref, w_ref, b_ref, node_ref, graph_ref,
                      *, num_layers):
    """One graph per grid step: all GIN layers + mean readout, VMEM-resident.

    a_ref : [Np, Np]     bf16 dense 0/1 adjacency (padded rows/cols zero)
    x_ref : [Np, Dp]     bf16 node features       (padded rows/cols zero)
    m_ref : [1,  Np]     f32  readout weights (1/n_real on real rows, else 0)
    w_ref : [L, Dp, Dp]  bf16 stacked layer weights (zero padded, shared)
    b_ref : [L, 1,  Dp]  f32  stacked biases        (zero padded, shared)
    node_ref  : [Np, Dp] f32  node embeddings (padded rows are garbage)
    graph_ref : [1,  Dp] f32  mean-over-real-nodes readout
    """
    a = a_ref[...]                         # bf16, 0/1 entries -> exact
    h = x_ref[...]                         # bf16 [Np, Dp]
    h_f32 = h.astype(jnp.float32)

    # L is tiny and static -> unrolled Python loop (visible to the scheduler).
    for l in range(num_layers):
        w = w_ref[l]                       # bf16 [Dp, Dp]
        b = b_ref[l]                       # f32  [1, Dp]
        # sum-aggregate neighbors + self (eps = 0); bf16 MXU, f32 accumulate
        agg = jnp.dot(a, h, preferred_element_type=jnp.float32) + h_f32
        z = jnp.dot(agg.astype(jnp.bfloat16), w,
                    preferred_element_type=jnp.float32) + b
        h_f32 = jnp.maximum(z, 0.0)        # ReLU (VPU, f32)
        h = h_f32.astype(jnp.bfloat16)     # single cast per layer

    node_ref[...] = h_f32

    # masked mean readout as a mask-row matmul on the MXU (no where/XLU pass)
    graph_ref[...] = jnp.dot(m_ref[...], h_f32,
                             preferred_element_type=jnp.float32)


# ------------------------------ JAX wrappers -------------------------------- #

def prepare_params(params, node_input_dim):
    """Pad + stack + pre-cast the layer params ONCE (hoisted out of forward)."""
    num_layers = len(params)
    d_hid = params[0][0].shape[1]
    d_pad = _round_up(max(node_input_dim, d_hid), LANE)

    w_stack = jnp.zeros((num_layers, d_pad, d_pad), jnp.float32)
    b_stack = jnp.zeros((num_layers, 1, d_pad), jnp.float32)
    for l, (w, b) in enumerate(params):
        w_stack = w_stack.at[l, :w.shape[0], :w.shape[1]].set(w)
        b_stack = b_stack.at[l, :, :b.shape[1]].set(b)
    return w_stack.astype(jnp.bfloat16), b_stack, d_hid


@functools.partial(jax.jit, static_argnames=("d_hid",))
def road_gnn_forward_batched(adj_b, x_b, w_stack, b_stack, *, d_hid):
    """Batched forward: adj_b [G,N,N], x_b [G,N,Din] -> (node, graph) embs."""
    g, n, d_in = x_b.shape
    num_layers = int(w_stack.shape[0])
    d_pad = int(w_stack.shape[-1])
    n_pad = _round_up(max(n, SUBLANE), SUBLANE)

    # zero-pad to lane/sublane-friendly shapes; A/x shipped pre-cast to bf16
    adj_p = jnp.zeros((g, n_pad, n_pad), jnp.bfloat16)
    adj_p = adj_p.at[:, :n, :n].set(adj_b.astype(jnp.bfloat16))
    x_p = jnp.zeros((g, n_pad, d_pad), jnp.bfloat16)
    x_p = x_p.at[:, :n, :d_in].set(x_b.astype(jnp.bfloat16))
    mask = jnp.zeros((g, 1, n_pad), jnp.float32).at[:, :, :n].set(1.0 / n)

    kernel = functools.partial(_fused_gnn_kernel, num_layers=num_layers)

    node_p, graph_p = pl.pallas_call(
        kernel,
        out_shape=(
            jax.ShapeDtypeStruct((g, n_pad, d_pad), jnp.float32),
            jax.ShapeDtypeStruct((g, 1, d_pad), jnp.float32),
        ),
        grid=(g,),
        in_specs=[
            # per-graph blocks (leading graph dim squeezed out of the Ref)
            pl.BlockSpec((None, n_pad, n_pad), lambda i: (i, 0, 0)),
            pl.BlockSpec((None, n_pad, d_pad), lambda i: (i, 0, 0)),
            pl.BlockSpec((None, 1, n_pad), lambda i: (i, 0, 0)),
            # shared params: constant block index -> DMA'd once, reused
            pl.BlockSpec((num_layers, d_pad, d_pad), lambda i: (0, 0, 0)),
            pl.BlockSpec((num_layers, 1, d_pad), lambda i: (0, 0, 0)),
        ],
        out_specs=[
            pl.BlockSpec((None, n_pad, d_pad), lambda i: (i, 0, 0)),
            pl.BlockSpec((None, 1, d_pad), lambda i: (i, 0, 0)),
        ],
        compiler_params=pltpu.CompilerParams(
            dimension_semantics=("parallel",)),   # shards graphs across TCs
    )(adj_p, x_p, mask, w_stack, b_stack)

    # strip padding
    return node_p[:, :n, :d_hid], graph_p[:, :, :d_hid]


def road_gnn_forward(adj, x, w_stack, b_stack, d_hid, readout=True):
    """Mirror of RoadGNN.forward for a single graph."""
    node_emb, graph_emb = road_gnn_forward_batched(
        adj[None], x[None], w_stack, b_stack, d_hid=d_hid)
    return graph_emb[0] if readout else node_emb[0]


# ------------------------------ Param init ---------------------------------- #

def init_params(key, node_input_dim, node_hidden_dim, num_layers):
    params = []
    d_in = node_input_dim
    for _ in range(num_layers):
        key, kw, kb = jax.random.split(key, 3)
        w = jax.random.normal(kw, (d_in, node_hidden_dim), jnp.float32) * 0.1
        b = jax.random.normal(kb, (1, node_hidden_dim), jnp.float32) * 0.01
        params.append((w, b))
        d_in = node_hidden_dim
    return params


# --------------------------------- Main ------------------------------------- #

if __name__ == "__main__":
    # "parameters": id_emb_dim=16, hid_dim=32, num_layers=2, dropout=0.1 (eval)
    NUM_GRAPHS = 4
    N_NODES = 8
    ID_EMB_DIM = 16
    HID_DIM = 32
    NUM_LAYERS = 2

    key = jax.random.PRNGKey(0)
    key, k_adj, k_x, k_p = jax.random.split(key, 4)

    # deterministic random undirected graphs (no self loops; self handled in kernel)
    logits = jax.random.uniform(k_adj, (NUM_GRAPHS, N_NODES, N_NODES))
    adj = (logits + jnp.swapaxes(logits, -1, -2) > 1.0).astype(jnp.float32)
    adj = adj * (1.0 - jnp.eye(N_NODES, dtype=jnp.float32))

    # node id embeddings  [graphs, node size, id dim]
    x = jax.random.normal(k_x, (NUM_GRAPHS, N_NODES, ID_EMB_DIM), jnp.float32)

    params = init_params(k_p, ID_EMB_DIM, HID_DIM, NUM_LAYERS)
    w_stack, b_stack, d_hid = prepare_params(params, ID_EMB_DIM)  # once

    # single fused, batched forward pass -> node and graph embeddings
    node_emb, graph_emb = road_gnn_forward_batched(
        adj, x, w_stack, b_stack, d_hid=d_hid)
    node_emb = jax.block_until_ready(node_emb)
    graph_emb = jax.block_until_ready(graph_emb)

    assert node_emb.shape == (NUM_GRAPHS, N_NODES, HID_DIM)
    assert graph_emb.shape == (NUM_GRAPHS, 1, HID_DIM)

    # sanity check against pure-JAX f32 reference (kernel uses bf16 MXU
    # operands with f32 accumulation -> allow ~1% numerical slack)
    h_ref = x
    for (w, b) in params:
        h_ref = jnp.maximum((adj @ h_ref + h_ref) @ w + b, 0.0)
    g_ref = jnp.mean(h_ref, axis=1, keepdims=True)
    assert jnp.allclose(node_emb, h_ref, atol=5e-2, rtol=5e-2)
    assert jnp.allclose(graph_emb, g_ref, atol=5e-2, rtol=5e-2)

    print("KERNEL_OK")
</pallas_src>

<mosaic_0001>
module attributes {stable_mosaic.version = 11 : i64} {
  func.func @_fused_gnn_kernel(%arg0: i32, %arg1: memref<1x8x8xbf16, #tpu.memory_space<vmem>>, %arg2: memref<1x8x128xbf16, #tpu.memory_space<vmem>>, %arg3: memref<1x1x8xf32, #tpu.memory_space<vmem>>, %arg4: memref<2x128x128xbf16, #tpu.memory_space<vmem>>, %arg5: memref<2x1x128xf32, #tpu.memory_space<vmem>>, %arg6: memref<1x8x128xf32, #tpu.memory_space<vmem>>, %arg7: memref<1x1x128xf32, #tpu.memory_space<vmem>>) attributes {dimension_semantics = [#tpu.dimension_semantics<parallel>], iteration_bounds = array<i64: 4>, scalar_prefetch = 0 : i64, scratch_operands = 0 : i64, tpu.core_type = #tpu.core_type<tc>, window_params = [{transform_indices = @transform_0, window_bounds = array<i64: 1, 8, 8>}, {transform_indices = @transform_1, window_bounds = array<i64: 1, 8, 128>}, {transform_indices = @transform_2, window_bounds = array<i64: 1, 1, 8>}, {pipeline_mode = #tpu.pipeline_mode<synchronous>, transform_indices = @transform_3, window_bounds = array<i64: 2, 128, 128>}, {pipeline_mode = #tpu.pipeline_mode<synchronous>, transform_indices = @transform_4, window_bounds = array<i64: 2, 1, 128>}, {transform_indices = @transform_5, window_bounds = array<i64: 1, 8, 128>}, {transform_indices = @transform_6, window_bounds = array<i64: 1, 1, 128>}]} {
    %c0 = arith.constant 0 : index
    %c0_0 = arith.constant 0 : index
    %c0_1 = arith.constant 0 : index
    %0 = vector.load %arg1[%c0, %c0_0, %c0_1] : memref<1x8x8xbf16, #tpu.memory_space<vmem>>, vector<1x8x8xbf16>
    %1 = vector.shape_cast %0 : vector<1x8x8xbf16> to vector<8x8xbf16>
    %c0_2 = arith.constant 0 : index
    %c0_3 = arith.constant 0 : index
    %c0_4 = arith.constant 0 : index
    %2 = vector.load %arg2[%c0_2, %c0_3, %c0_4] : memref<1x8x128xbf16, #tpu.memory_space<vmem>>, vector<1x8x128xbf16>
    %3 = vector.shape_cast %2 : vector<1x8x128xbf16> to vector<8x128xbf16>
    %4 = arith.extf %3 : vector<8x128xbf16> to vector<8x128xf32>
    %c0_5 = arith.constant 0 : index
    %c0_6 = arith.constant 0 : index
    %c0_7 = arith.constant 0 : index
    %5 = vector.load %arg4[%c0_5, %c0_6, %c0_7] : memref<2x128x128xbf16, #tpu.memory_space<vmem>>, vector<1x128x128xbf16>
    %6 = vector.shape_cast %5 : vector<1x128x128xbf16> to vector<128x128xbf16>
    %c0_8 = arith.constant 0 : index
    %c0_9 = arith.constant 0 : index
    %c0_10 = arith.constant 0 : index
    %7 = vector.load %arg5[%c0_8, %c0_9, %c0_10] : memref<2x1x128xf32, #tpu.memory_space<vmem>>, vector<1x1x128xf32>
    %8 = vector.shape_cast %7 : vector<1x1x128xf32> to vector<1x128xf32>
    %cst = arith.constant dense<0.000000e+00> : vector<8x128xf32>
    %9 = tpu.matmul %1, %3, %cst {dimension_numbers = #tpu.dot_dimension_numbers<[1], [0], [0], [1], [0, 0, 1, 1], [], []>} : vector<8x8xbf16>, vector<8x128xbf16>, vector<8x128xf32> -> vector<8x128xf32>
    %10 = arith.addf %9, %4 : vector<8x128xf32>
    %11 = arith.truncf %10 : vector<8x128xf32> to vector<8x128xbf16>
    %cst_11 = arith.constant dense<0.000000e+00> : vector<8x128xf32>
    %12 = tpu.matmul %11, %6, %cst_11 {dimension_numbers = #tpu.dot_dimension_numbers<[1], [0], [0], [1], [0, 0, 1, 1], [], []>} : vector<8x128xbf16>, vector<128x128xbf16>, vector<8x128xf32> -> vector<8x128xf32>
    %13 = vector.broadcast %8 : vector<1x128xf32> to vector<8x128xf32>
    %14 = arith.addf %12, %13 : vector<8x128xf32>
    %cst_12 = arith.constant 0.000000e+00 : f32
    %15 = vector.broadcast %cst_12 : f32 to vector<8x128xf32>
    %16 = arith.maximumf %14, %15 : vector<8x128xf32>
    %17 = arith.truncf %16 : vector<8x128xf32> to vector<8x128xbf16>
    %c1 = arith.constant 1 : index
    %c0_13 = arith.constant 0 : index
    %c0_14 = arith.constant 0 : index
    %18 = vector.load %arg4[%c1, %c0_13, %c0_14] : memref<2x128x128xbf16, #tpu.memory_space<vmem>>, vector<1x128x128xbf16>
    %19 = vector.shape_cast %18 : vector<1x128x128xbf16> to vector<128x128xbf16>
    %c1_15 = arith.constant 1 : index
    %c0_16 = arith.constant 0 : index
    %c0_17 = arith.constant 0 : index
    %20 = vector.load %arg5[%c1_15, %c0_16, %c0_17] : memref<2x1x128xf32, #tpu.memory_space<vmem>>, vector<1x1x128xf32>
    %21 = vector.shape_cast %20 : vector<1x1x128xf32> to vector<1x128xf32>
    %cst_18 = arith.constant dense<0.000000e+00> : vector<8x128xf32>
    %22 = tpu.matmul %1, %17, %cst_18 {dimension_numbers = #tpu.dot_dimension_numbers<[1], [0], [0], [1], [0, 0, 1, 1], [], []>} : vector<8x8xbf16>, vector<8x128xbf16>, vector<8x128xf32> -> vector<8x128xf32>
    %23 = arith.addf %22, %16 : vector<8x128xf32>
    %24 = arith.truncf %23 : vector<8x128xf32> to vector<8x128xbf16>
    %cst_19 = arith.constant dense<0.000000e+00> : vector<8x128xf32>
    %25 = tpu.matmul %24, %19, %cst_19 {dimension_numbers = #tpu.dot_dimension_numbers<[1], [0], [0], [1], [0, 0, 1, 1], [], []>} : vector<8x128xbf16>, vector<128x128xbf16>, vector<8x128xf32> -> vector<8x128xf32>
    %26 = vector.broadcast %21 : vector<1x128xf32> to vector<8x128xf32>
    %27 = arith.addf %25, %26 : vector<8x128xf32>
    %cst_20 = arith.constant 0.000000e+00 : f32
    %28 = vector.broadcast %cst_20 : f32 to vector<8x128xf32>
    %29 = arith.maximumf %27, %28 : vector<8x128xf32>
    %c0_21 = arith.constant 0 : index
    %c0_22 = arith.constant 0 : index
    %c0_23 = arith.constant 0 : index
    %30 = vector.load %arg6[%c0_21, %c0_22, %c0_23] : memref<1x8x128xf32, #tpu.memory_space<vmem>>, vector<1x8x128xf32>
    %31 = vector.shape_cast %30 : vector<1x8x128xf32> to vector<8x128xf32>
    %32 = vector.shape_cast %29 : vector<8x128xf32> to vector<1x8x128xf32>
    tpu.vector_store %arg6[%c0_21, %c0_22, %c0_23], %32 {strides = array<i32>} : memref<1x8x128xf32, #tpu.memory_space<vmem>>, vector<1x8x128xf32>,
    %c0_24 = arith.constant 0 : index
    %c0_25 = arith.constant 0 : index
    %c0_26 = arith.constant 0 : index
    %33 = vector.load %arg3[%c0_24, %c0_25, %c0_26] : memref<1x1x8xf32, #tpu.memory_space<vmem>>, vector<1x1x8xf32>
    %34 = vector.shape_cast %33 : vector<1x1x8xf32> to vector<1x8xf32>
    %cst_27 = arith.constant dense<0.000000e+00> : vector<1x128xf32>
    %35 = tpu.matmul %34, %29, %cst_27 {dimension_numbers = #tpu.dot_dimension_numbers<[1], [0], [0], [1], [0, 0, 1, 1], [], []>} : vector<1x8xf32>, vector<8x128xf32>, vector<1x128xf32> -> vector<1x128xf32>
    %c0_28 = arith.constant 0 : index
    %c0_29 = arith.constant 0 : index
    %c0_30 = arith.constant 0 : index
    %36 = vector.load %arg7[%c0_28, %c0_29, %c0_30] : memref<1x1x128xf32, #tpu.memory_space<vmem>>, vector<1x1x128xf32>
    %37 = vector.shape_cast %36 : vector<1x1x128xf32> to vector<1x128xf32>
    %38 = vector.shape_cast %35 : vector<1x128xf32> to vector<1x1x128xf32>
    tpu.vector_store %arg7[%c0_28, %c0_29, %c0_30], %38 {strides = array<i32>} : memref<1x1x128xf32, #tpu.memory_space<vmem>>, vector<1x1x128xf32>,
    return
  }
  func.func @transform_0(%arg0: i32) -> (i32, i32, i32) {
    %c0_i32 = arith.constant 0 : i32
    %c0_i32_0 = arith.constant 0 : i32
    %c0_i32_1 = arith.constant 0 : i32
    return %arg0, %c0_i32, %c0_i32_0 : i32, i32, i32
  }
  func.func @transform_1(%arg0: i32) -> (i32, i32, i32) {
    %c0_i32 = arith.constant 0 : i32
    %c0_i32_0 = arith.constant 0 : i32
    %c0_i32_1 = arith.constant 0 : i32
    return %arg0, %c0_i32, %c0_i32_0 : i32, i32, i32
  }
  func.func @transform_2(%arg0: i32) -> (i32, i32, i32) {
    %c0_i32 = arith.constant 0 : i32
    %c0_i32_0 = arith.constant 0 : i32
    %c0_i32_1 = arith.constant 0 : i32
    return %arg0, %c0_i32, %c0_i32_0 : i32, i32, i32
  }
  func.func @transform_3(%arg0: i32) -> (i32, i32, i32) {
    %c0_i32 = arith.constant 0 : i32
    %c0_i32_0 = arith.constant 0 : i32
    %c0_i32_1 = arith.constant 0 : i32
    %c0_i32_2 = arith.constant 0 : i32
    return %c0_i32, %c0_i32_0, %c0_i32_1 : i32, i32, i32
  }
  func.func @transform_4(%arg0: i32) -> (i32, i32, i32) {
    %c0_i32 = arith.constant 0 : i32
    %c0_i32_0 = arith.constant 0 : i32
    %c0_i32_1 = arith.constant 0 : i32
    %c0_i32_2 = arith.constant 0 : i32
    return %c0_i32, %c0_i32_0, %c0_i32_1 : i32, i32, i32
  }
  func.func @transform_5(%arg0: i32) -> (i32, i32, i32) {
    %c0_i32 = arith.constant 0 : i32
    %c0_i32_0 = arith.constant 0 : i32
    %c0_i32_1 = arith.constant 0 : i32
    return %arg0, %c0_i32, %c0_i32_0 : i32, i32, i32
  }
  func.func @transform_6(%arg0: i32) -> (i32, i32, i32) {
    %c0_i32 = arith.constant 0 : i32
    %c0_i32_0 = arith.constant 0 : i32
    %c0_i32_1 = arith.constant 0 : i32
    return %arg0, %c0_i32, %c0_i32_0 : i32, i32, i32
  }
}

</mosaic_0001>

<bundles_post_ra>
// kernel: road_gnn_forward_batched.1
= control target key start
LH: loop header
LB: loop body
LE: loop exit
PB: predicated region body
PF: predicated region fallthrough
CT: control target
= control target key end

     0   :  { %12 = vsyncpa [#allocation3], 0  ;;  %s1370_s0 = inlined_call_operand.vmem [shape: bf16[4,8,8], index: 0, kind: input, shape index: {}]   ;;  %s1371_s1 = inlined_call_operand.vmem [shape: bf16[4,8,128], index: 1, kind: input, shape index: {}]   ;;  %s1372_s2 = inlined_call_operand.vmem [shape: f32[4,1,8], index: 2, kind: input, shape index: {}]   ;;  %s1373_s3 = inlined_call_operand.vmem [shape: bf16[2,128,128], index: 3, kind: input, shape index: {}]   ;;  %s1374_s4 = inlined_call_operand.vmem [shape: f32[2,1,128], index: 4, kind: input, shape index: {}]   ;;  %s1375_s5 = inlined_call_operand.hbm [shape: f32[4,8,128], index: 5, kind: output, shape index: {0}]   ;;  %s1376_s6 = inlined_call_operand.hbm [shape: f32[4,1,128], index: 6, kind: output, shape index: {1}]  }
   0x1   :  { %14 = vsyncpa [#allocation3 + $0x1], 0 }
   0x2   :  { %15 = vsyncpa [#allocation5], 0 }
   0x3   :  { %17 = vsyncpa [#allocation5 + $0x1], 0  ;;  %s1151_s21 = smov 0   ;;  %s1153_s22 = smov 0  }
   0x4   :  { %s1155_s23 = smov 0   ;;  %s1157_s24 = smov 0  }
   0x5 LB: > { %s1172_s25 = sadd.s32 4294967295, %s1110_s24   ;;  %s827_s26 = sadd.s32 4294967294, %s1110_s24   ;;  %s1110_s24 = sphi %s1157_s24, %s1382_s24   ;;  %s1106_s23 = sphi %s1155_s23, %s1381_s23   ;;  %s1102_s22 = sphi %s1153_s22, %s1380_s22   ;;  %s1098_s21 = sphi %s1151_s21, %s1379_s21  }
   0x6   : > { %s1176_s27 = sadd.s32 1, %s1110_s24   ;;  %s150_s28 = sadd.s32 1, %s1106_s23 }
   0x7   : > { %s147_s29 = ssub.s32 %s1110_s24, %s1176_s27  ;;  %p160_p0 = scmp.ne.s32.totalorder %s1106_s23, %s1102_s22 }
   0x8   : > { %p148_p1 = scmp.eq.s32.totalorder %s147_s29, 0  ;;  %p161_p2 = scmp.eq.s32.totalorder %s1172_s25, 3 }
   0x9   : > { %p166_p3 = scmp.ne.s32.totalorder %s1102_s22, %s1098_s21  ;;  %p167_p4 = scmp.eq.s32.totalorder %s827_s26, 3 }
   0xa   : > { %s1187_s30 = scalar_select %p148_p1, %s1106_s23, %s150_s28  }
   0xb   : > { %p1189_p5 = por %p161_p2, %p160_p0  ;;  %p1193_p6 = por %p167_p4, %p166_p3 }
   0xc   : > { %p830_p7 = scmp.ge.s32.totalorder %s1110_s24, 1  ;;  %p237_p8 = scmp.lt.s32.totalorder %s1110_s24, 5 }
   0xe   : > { %p238_p9 = pnand %p830_p7, %p237_p8 }
   0xf   : > { %p277_p10 = scmp.lt.s32.totalorder (!%p238_p9), %s1172_s25, 3  ;;  %s1295_s29 = sand.u32 (!%p238_p9), 1, %s1102_s22  }
  0x10   : > { %241 = sbr.rel (%p238_p9) target bundleno = 1032 (0x408), region = 40  ;;  %s831_s12 = sshll.u32 (!%p238_p9), %s1295_s29, 3 }
  0x11   : > { %s873_s17 = sshll.u32 (!%p238_p9), %s1172_s25, 7 }
  0x12   : > { %s704_s20 = scalar_lea.hbm (!%p238_p9), %s1375_s5, %s873_s17 }
  0x15   : > { %v1112_v0 = vmov 0.0   ;;  %vm1113_vm0 = vmmov 0   ;;  %s1204_s9 = scalar_select %p277_p10, %s1172_s25, 3  ;;  %vm313_vm1 = vcmask 1043456   ;;  %vm309_vm2 = vcmask 64512   ;;  %v1004_v3 = vld [vmem:[%s1373_s3 + $0x38] sm:$0xff]  }
  0x16   : > { %901 = vmatprep.subr.bf16.mxu1 %v1112_v0  ;;  %903 = vmatprep.mubr.msk.bf16.mxu1 %vm1113_vm0, %v1112_v0  ;;  %v1005_v5 = vld [vmem:[%s1373_s3 + $0x30] sm:$0xff]   ;;  %v1006_v6 = vld [vmem:[%s1373_s3 + $0x28] sm:$0xff]   ;;  %v1007_v7 = vld [vmem:[%s1373_s3 + $0x20] sm:$0xff]  }
  0x17   : > { %927 = vmatprep.subr.bf16.mxu0 %v1112_v0  ;;  %929 = vmatprep.mubr.msk.bf16.mxu0 %vm1113_vm0, %v1112_v0  ;;  %s832_s10 = sshll.u32 %s1204_s9, 2  ;;  %v1008_v8 = vld [vmem:[%s1373_s3 + $0x18] sm:$0xff]   ;;  %v1009_v9 = vld [vmem:[%s1373_s3 + $0x10] sm:$0xff]   ;;  %v1010_v10 = vld [vmem:[%s1373_s3 + $0x8] sm:$0xff]   ;;  %s287_s15 = scalar_lea.vmem %s1372_s2, %s1204_s9 }
  0x18   : > { %s284_s13 = scalar_lea.vmem %s1371_s1, %s832_s10  ;;  %s280_s16 = scalar_lea.vmem %s1370_s0, %s832_s10  ;;  %v1011_v11 = vld [vmem:[%s1373_s3] sm:$0xff]   ;;  %v1012_v28 = vld [vmem:[%s1373_s3 + $0x78] sm:$0xff]   ;;  %v1013_v29 = vld [vmem:[%s1373_s3 + $0x70] sm:$0xff]  }
  0x19   : > { %v290_v1 = vld [vmem:[%s284_s13] sm:$0xf]  ;;  %v1014_v30 = vld [vmem:[%s1373_s3 + $0x68] sm:$0xff]   ;;  %v1016_v32 = vld [vmem:[%s1373_s3 + $0x58] sm:$0xff]   ;;  %s689_s9 = scalar_lea.sflag [#allocation3], %s1295_s29  ;;  %s1114_s10 = smov [#allocation2]  }
  0x1a   : > { %v315_v2 = vsel %vm313_vm1, %v290_v1, 0  ;;  %v289_v4 = vld [vmem:[%s280_s16] sm:$0xf]  ;;  %v291_v12 = vunpack.c.l.bf16 %v290_v1  ;;  %v1017_v33 = vld [vmem:[%s1373_s3 + $0x50] sm:$0xff]   ;;  %v1018_v34 = vld [vmem:[%s1373_s3 + $0x48] sm:$0xff]   ;;  %s270_s16 = scalar_lea.vmem [#allocation2], %s831_s12 }
  0x1b   : > { %902 = vmatpush3.bf16.msra.mxu1 %v315_v2  ;;  %v835_v19 = vld [vmem:[%s1374_s4] ss:$0 sm:$0xff]  ;;  %v862_v42 = vld [vmem:[%s1374_s4 + $0x1] ss:$0 sm:$0xff]  ;;  %s706_s26 = sshll.u32 %s270_s16, 4  ;;  %s1024_s11 = sshll.u32 %s1114_s10, 4  ;;  %s707_s26 = int_to_ptr.vmem [resolvable:$true] %s706_s26  ;;  %s1025_s11 = int_to_ptr.vmem [resolvable:$false] %s1024_s11 }
  0x1c   : > { %907 = vmatprep.subr.bf16.mxu1 %v1112_v0  ;;  %v1015_v31 = vld [vmem:[%s1373_s3 + $0x60] sm:$0xff]   ;;  %s1020_s28 = scalar_lea.vmem %s707_s26, 128  ;;  %s1026_s12 = scalar_lea.vmem %s1025_s11, 256 }
  0x1d   : > { %v1019_v35 = vld [vmem:[%s1373_s3 + $0x40] sm:$0xff]   ;;  %p1021_p11 = scmp.ne.s32.totalorder %s707_s26, %s1020_s28  ;;  %p1027_p0 = scmp.lt.s32.totalorder %s707_s26, %s1025_s11 }
  0x1e   : > { %904 = vmatmul.mubr.msk.bf16.vlgmr.msra.gmra.mxu1 %vm309_vm2, %v289_v4  ;;  %v613_v47 = vld [vmem:[%s287_s15] sm:$0x1]  ;;  %p1028_p1 = scmp.lt.s32.totalorder %s1026_s12, %s1020_s28 }
  0x1f   : > { %908 = vmatpush3.bf16.msra.mxu1 %v1004_v3  ;;  %923 = vmatprep.mubr.msk.bf16.mxu1 %vm1113_vm0, %v1112_v0  ;;  %p1022_p12 = pnand %p1021_p11, %p1189_p5 }
  0x20   : > { %909 = vmatprep.subr.bf16.mxu1 %v1112_v0  ;;  %p1029_p2 = por %p1028_p1, %p1027_p0 }
  0x21   : > { %p1023_p13 = pneg %p1022_p12 }
  0x23   : > { %910 = vmatpush3.bf16.msra.mxu1 %v1005_v5  ;;  %p1030_p3 = pnand %p1029_p2, %p1023_p13 }
  0x24   : > { %911 = vmatprep.subr.bf16.mxu1 %v1112_v0 }
  0x27   : > { %912 = vmatpush3.bf16.msra.mxu1 %v1006_v6 }
  0x28   : > { %913 = vmatprep.subr.bf16.mxu1 %v1112_v0 }
  0x2b   : > { %914 = vmatpush3.bf16.msra.mxu1 %v1007_v7 }
  0x2c   : > { %915 = vmatprep.subr.bf16.mxu1 %v1112_v0 }
  0x2f   : > { %916 = vmatpush3.bf16.msra.mxu1 %v1008_v8 }
  0x30   : > { %917 = vmatprep.subr.bf16.mxu1 %v1112_v0 }
  0x33   : > { %918 = vmatpush3.bf16.msra.mxu1 %v1009_v9 }
  0x34   : > { %919 = vmatprep.subr.bf16.mxu1 %v1112_v0 }
  0x37   : > { %920 = vmatpush3.bf16.msra.mxu1 %v1010_v10 }
  0x38   : > { %921 = vmatprep.subr.bf16.mxu1 %v1112_v0 }
  0x3b   : > { %922 = vmatpush3.bf16.msra.mxu1 %v1011_v11 }
  0x3c   : > { %953 = vmatprep.subr.mxu1 %v1112_v0 }
  0xde   : > { %v351_v13 = vpop.f32.mrf.mxu1 }
  0xdf   : > { %v352_v14 = vadd.f32 %v351_v13, %v291_v12 }
  0xe0   : > { %v905_v15 = vpop.f32.mrf.mxu1 }
  0xe1   : > { %v357_v16 = vpack.c.bf16 %v352_v14, %v352_v14 }
  0xe2   : > { %v354_v17 = vpop.f32.mrf.mxu1 }
  0xe3   : > { %924 = vmatmul.mubr.bf16.vlgmr.msra.gmra.mxu1 %v357_v16 }
  0xe4   : > { %v906_v18 = vpop.f32.mrf.mxu1  ;;  %955 = vmatprep.mubr.msk.f32.mxu1 %vm1113_vm0, %v1112_v0 }
 0x1a3   : > { %v446_v20 = vpop.f32.mrf.mxu1 }
 0x1a4   : > { %v447_v21 = vadd.f32 %v835_v19, %v446_v20 }
 0x1a5   : > { %v925_v22 = vpop.f32.mrf.mxu1 }
 0x1a6   : > { %v452_v23 = vmax.f32 %v447_v21, 0.0 }
 0x1a7   : > { %v449_v24 = vpop.f32.mrf.mxu1 }
 0x1a8   : > { %v453_v25 = vpack.c.bf16 %v452_v23, %v452_v23 }
 0x1a9   : > { %v926_v26 = vpop.f32.mrf.mxu1 }
 0x1aa   : > { %v474_v27 = vsel %vm313_vm1, %v453_v25, 0 }
 0x1ab   : > { %928 = vmatpush3.bf16.msra.mxu0 %v474_v27 }
 0x1ac   : > { %933 = vmatprep.subr.bf16.mxu0 %v1112_v0 }
 0x1ae   : > { %930 = vmatmul.mubr.msk.bf16.vlgmr.msra.gmra.mxu0 %vm309_vm2, %v289_v4 }
 0x1af   : > { %934 = vmatpush3.bf16.msra.mxu0 %v1012_v28  ;;  %949 = vmatprep.mubr.msk.bf16.mxu0 %vm1113_vm0, %v1112_v0 }
 0x1b0   : > { %935 = vmatprep.subr.bf16.mxu0 %v1112_v0 }
 0x1b3   : > { %936 = vmatpush3.bf16.msra.mxu0 %v1013_v29 }
 0x1b4   : > { %937 = vmatprep.subr.bf16.mxu0 %v1112_v0 }
 0x1b7   : > { %938 = vmatpush3.bf16.msra.mxu0 %v1014_v30 }
 0x1b8   : > { %939 = vmatprep.subr.bf16.mxu0 %v1112_v0 }
 0x1bb   : > { %940 = vmatpush3.bf16.msra.mxu0 %v1015_v31 }
 0x1bc   : > { %941 = vmatprep.subr.bf16.mxu0 %v1112_v0 }
 0x1bf   : > { %942 = vmatpush3.bf16.msra.mxu0 %v1016_v32 }
 0x1c0   : > { %943 = vmatprep.subr.bf16.mxu0 %v1112_v0 }
 0x1c3   : > { %944 = vmatpush3.bf16.msra.mxu0 %v1017_v33 }
 0x1c4   : > { %945 = vmatprep.subr.bf16.mxu0 %v1112_v0 }
 0x1c7   : > { %946 = vmatpush3.bf16.msra.mxu0 %v1018_v34 }
 0x1c8   : > { %947 = vmatprep.subr.bf16.mxu0 %v1112_v0 }
 0x1cb   : > { %948 = vmatpush3.bf16.msra.mxu0 %v1019_v35 }
 0x26e   : > { %v510_v36 = vpop.f32.mrf.mxu0 }
 0x26f   : > { %v511_v37 = vadd.f32 %v510_v36, %v452_v23 }
 0x270   : > { %v931_v38 = vpop.f32.mrf.mxu0 }
 0x271   : > { %v516_v39 = vpack.c.bf16 %v511_v37, %v511_v37 }
 0x272   : > { %v513_v40 = vpop.f32.mrf.mxu0 }
 0x273   : > { %950 = vmatmul.mubr.bf16.vlgmr.msra.gmra.mxu0 %v516_v39 }
 0x274   : > { %v932_v41 = vpop.f32.mrf.mxu0 }
 0x333   : > { %v605_v43 = vpop.f32.mrf.mxu0 }
 0x334   : > { %v606_v44 = vadd.f32 %v862_v42, %v605_v43 }
 0x335   : > { %v951_v45 = vpop.f32.mrf.mxu0 }
 0x336   : > { %v611_v46 = vmax.f32 %v606_v44, 0.0 }
 0x337   : > { %v608_v48 = vpop.f32.mrf.mxu0 }
 0x338   : > { %612 = vst [vmem:[%s270_s16] sm:$0xff] %v611_v46  ;;  %954 = vmatpush3.msra.mxu1 %v611_v46 }
 0x339   : > { %v952_v49 = vpop.f32.mrf.mxu0  ;;  %956 = vmatmul.mubr.msk.f32.vlgmr.msra.gmra.mxu1 %vm309_vm2, %v613_v47 }
 0x33a   : > { %1033 = shalt.err (!%p1030_p3)
}
 0x33b   : > { %s1034_s13 = scalar_lea.hbm %s704_s20, 128  ;;  %s1038_s16 = scalar_lea.hbm %s1375_s5, 512 }
 0x33c   : > { %p1035_p4 = scmp.ne.s32.totalorder %s704_s20, %s1034_s13  ;;  %p1039_p9 = scmp.lt.s32.totalorder %s704_s20, %s1375_s5 }
 0x33d   : > { %p1040_p10 = scmp.lt.s32.totalorder %s1038_s16, %s1034_s13 }
 0x33e   : > { %p1036_p7 = pnand %p1035_p4, %p1189_p5 }
 0x33f   : > { %p1041_p11 = por %p1040_p10, %p1039_p9 }
 0x340   : > { %p1037_p8 = pneg %p1036_p7 }
 0x342   : > { %p1042_p12 = pnand %p1041_p11, %p1037_p8 }
 0x344   : > { %1045 = shalt.err (!%p1042_p12)
}
 0x345   : > { %958 = dma.vmem_to_hbm [thread:$0]  (%p1189_p5), %s707_s26, 128, %s704_s20, %s689_s9  }
 0x346   : > { %s276_s19 = scalar_lea.vmem [#allocation4], %s1295_s29  ;;  %s874_s10 = sshll.u32 %s1172_s25, 4 }
 0x347   : > { %s719_s28 = sshll.u32 %s276_s19, 4  ;;  %s1330_s13 = scalar_lea.hbm %s1376_s6, %s874_s10  ;;  %s1325_s28 = int_to_ptr.vmem [resolvable:$true] %s719_s28 }
 0x348   : > { %s694_s14 = scalar_lea.sflag [#allocation5], %s1295_s29  ;;  %s1046_s15 = scalar_lea.vmem %s1325_s28, 16 }
 0x349   : > { %p1047_p13 = scmp.ne.s32.totalorder %s1325_s28, %s1046_s15  ;;  %s1115_s25 = smov [#allocation4]  }
 0x34a   : > { %s1050_s20 = sshll.u32 %s1115_s25, 4  ;;  %s1051_s20 = int_to_ptr.vmem [resolvable:$false] %s1050_s20 }
 0x34b   : > { %p1048_p0 = pnand %p1047_p13, %p1189_p5  ;;  %s1052_s26 = scalar_lea.vmem %s1051_s20, 32 }
 0x34c   : > { %p1053_p2 = scmp.lt.s32.totalorder %s1325_s28, %s1051_s20  ;;  %p1054_p3 = scmp.lt.s32.totalorder %s1052_s26, %s1046_s15 }
 0x34d   : > { %p1049_p1 = pneg %p1048_p0 }
 0x34e   : > { %p1055_p4 = por %p1054_p3, %p1053_p2 }
 0x350   : > { %p1056_p7 = pnand %p1055_p4, %p1049_p1 }
 0x3f9   : > { %v683_v50 = vpop.f32.mrf.mxu1 }
 0x3fa   : > { %687 = vst [vmem:[%s276_s19] sm:$0x1] %v683_v50 }
 0x3fb   : > { %v957_v51 = vpop.f32.mrf.mxu1 }
 0x3fc   : > { %1059 = shalt.err (!%p1056_p7)
}
 0x3fd   : > { %s1060_s9 = scalar_lea.hbm %s1330_s13, 16  ;;  %s1064_s17 = scalar_lea.hbm %s1376_s6, 64 }
 0x3fe   : > { %p1061_p8 = scmp.ne.s32.totalorder %s1330_s13, %s1060_s9  ;;  %p1065_p11 = scmp.lt.s32.totalorder %s1330_s13, %s1376_s6 }
 0x3ff   : > { %p1066_p12 = scmp.lt.s32.totalorder %s1064_s17, %s1060_s9 }
 0x400   : > { %p1062_p9 = pnand %p1061_p8, %p1189_p5 }
 0x401   : > { %p1067_p13 = por %p1066_p12, %p1065_p11 }
 0x402   : > { %p1063_p10 = pneg %p1062_p9 }
 0x404   : > { %p1068_p0 = pnand %p1067_p13, %p1063_p10 }
 0x406   : > { %1071 = shalt.err (!%p1068_p0)
}
 0x407   : > { %959 = dma.vmem_to_hbm [thread:$0]  (%p1189_p5), %s1325_s28, 16, %s1330_s13, %s694_s14  }
 0x408 PF: > { %p969_p1 = scmp.ge.s32.totalorder %s1110_s24, 2  ;;  %s731_s10 = sand.u32 1, %s1098_s21  }
 0x409   : > { %s732_s11 = scalar_lea.sflag [#allocation3], %s731_s10 }
 0x40a   : > { %p963_p2 = pnand %p969_p1, %p1193_p6 }
 0x40c   : > { %p964_p3 = pneg %p963_p2 }
 0x40e   : > { %1089 = dma.done.wait (%p964_p3), %s732_s11, 128  }
 0x40f   : > { %1091 = vsyncadd (%p964_p3), %s732_s11, 4294967168  ;;  %s741_s12 = scalar_lea.sflag [#allocation5], %s731_s10 }
 0x410   : > { %1093 = dma.done.wait (%p964_p3), %s741_s12, 16  }
 0x411   : > { %1095 = vsyncadd (%p964_p3), %s741_s12, 4294967280  ;;  %p20_p5 = scmp.ge.s32.totalorder %s1176_s27, 6   ;;  %s1379_s21 = smov %s1102_s22 }
 0x412   : > { %s1380_s22 = smov %s1106_s23  ;;  %s1381_s23 = smov %s1187_s30 }
 0x413   : > { %s1382_s24 = smov %s1176_s27  ;;  %22 = sbr.rel (!%p20_p5) target bundleno = 5 (0x5), region = 100 }
 0x418   :  { %745 = vsyncpa [#allocation3], 1 }
 0x419   :  { %747 = vsyncpa [#allocation3 + $0x1], 1 }
 0x41a   :  { %748 = vsyncpa [#allocation5], 1 }
 0x41b   :  { %750 = vsyncpa [#allocation5 + $0x1], 1 }

</bundles_post_ra>
